<compile_context>
chip_gen: v7x
topology: tpu7x:2x2x1
jax: 0.10.0
libtpu: 0.0.40
codegen_flags: <defaults>
</compile_context>

<pallas_src>
import functools

import numpy as np
import jax
import jax.numpy as jnp
from jax import lax
from jax.experimental import pallas as pl
from jax.experimental.pallas import tpu as pltpu


_HALO = 7  # sum of conv dilations (1 + 2 + 4)


def _conv3_taps(hb, w, b_ref, d, fuse):
    """3-tap dilated conv in channel-major layout.

    hb: (C, Wi) bf16 covering window columns [off, off + Wi).
    w : (H, 3C) bf16 fused taps [tap0 | tap1 | tap2].
    Returns (H, Wi - 2d) f32 covering [off + d, off + Wi - d):
        out[t] = W0 @ h[t-d] + W1 @ h[t] + W2 @ h[t+d] + b
    bf16 operands, f32 accumulation on the MXU.
    """
    C = hb.shape[0]
    n = hb.shape[-1] - 2 * d
    if fuse:
        # Single K=3C matmul: ~3x fewer MXU pushes (v6e/v7x 256-wide MXU).
        rhs = jnp.concatenate(
            [hb[:, 0:n], hb[:, d:d + n], hb[:, 2 * d:2 * d + n]], axis=0)
        acc = jnp.dot(w, rhs, preferred_element_type=jnp.float32)
    else:
        acc = jnp.dot(w[:, 0:C], hb[:, 0:n],
                      preferred_element_type=jnp.float32)
        acc = acc + jnp.dot(w[:, C:2 * C], hb[:, d:d + n],
                            preferred_element_type=jnp.float32)
        acc = acc + jnp.dot(w[:, 2 * C:3 * C], hb[:, 2 * d:2 * d + n],
                            preferred_element_type=jnp.float32)
    return acc + b_ref[...]


def dblock_kernel(x_ref, wres_ref, bres_ref,
                  w0_ref, b0_ref, w1_ref, b1_ref, w2_ref, b2_ref,
                  o_ref, *, tile_t, size, fuse0, fuse12):
    t = pl.program_id(1)
    base = t * tile_t - _HALO          # global (downsampled) col of window col 0
    win = tile_t + 2 * _HALO

    x = x_ref[...]                     # (C_in, win) bf16; zeros outside [0, size)

    # 0/1 mask over the window's global columns.  Out-of-sequence columns are
    # zeroed after each conv so the next conv sees nn.Conv1d(padding=d)-style
    # zero padding; interior tile edges keep real halo data.  One (1, win) row:
    # essentially free, applied as a single multiply fused with the leaky-relu.
    g = base + lax.broadcasted_iota(jnp.int32, (1, win), 1)
    mask = jnp.logical_and(g >= 0, g < size).astype(jnp.float32)

    # Residual 1x1 conv (pointwise => commutes with the nearest-neighbour
    # downsample done in the wrapper), evaluated on the tile interior only.
    res = jnp.dot(wres_ref[...], x[:, _HALO:_HALO + tile_t],
                  preferred_element_type=jnp.float32) + bres_ref[...]

    def act(a, lo, hi):
        # leaky-relu (slope 0.2) + boundary zeroing, then bf16 for the next MXU op.
        return (jnp.maximum(a, 0.2 * a) * mask[:, lo:hi]).astype(jnp.bfloat16)

    h = jnp.maximum(x, 0.2 * x)                          # pad cols already zero
    a = _conv3_taps(h, w0_ref[...], b0_ref, 1, fuse0)    # width tile_t+12, off 1
    h = act(a, 1, win - 1)
    a = _conv3_taps(h, w1_ref[...], b1_ref, 2, fuse12)   # width tile_t+8,  off 3
    h = act(a, 3, win - 3)
    a = _conv3_taps(h, w2_ref[...], b2_ref, 4, fuse12)   # width tile_t,    off 7
    o_ref[...] = (a + res).astype(o_ref.dtype)


def _pick_tile(size, batch, max_tile):
    """Lane-aligned time tile; prefer a divisor of size (no tail-slice copy)."""
    mt = max(128, (max_tile // 128) * 128)
    if size <= max_tile:
        tile_t, n_t = size, 1
        # v7x has 2 TensorCores: keep >= 2 grid steps when it costs nothing.
        if batch == 1 and size >= 256 and size % 256 == 0 and size // 2 <= mt:
            tile_t, n_t = size // 2, 2
        return tile_t, n_t
    tile_t = next((c for c in range(mt, 127, -128) if size % c == 0), mt)
    return tile_t, -(-size // tile_t)


@functools.partial(jax.jit, static_argnames=("factor", "max_tile"))
def dblock_forward(x, params, factor, *, max_tile=2048):
    """x: (B, C_in, T) float32 -> (B, H, T // factor) float32 (PyTorch NCT)."""
    B, C_in, T = x.shape
    size = T // factor
    H = params["w_res"].shape[0]

    # F.interpolate 'nearest' gathers at floor(i*T/size); when T % factor == 0
    # this is exactly a stride-`factor` slice.
    if T == size * factor:
        x_ds = x[:, :, ::factor]
    else:
        idx = (np.arange(size) * T) // size
        x_ds = x[:, :, idx]
    x_ds = x_ds.astype(jnp.bfloat16)   # matmuls are bf16 anyway: halve input HBM

    tile_t, n_t = _pick_tile(size, B, max_tile)
    size_p = n_t * tile_t
    win = tile_t + 2 * _HALO

    # Zero-pad (correct conv boundary behaviour for the first layer) and unfold
    # into overlapping haloed windows (B*n_t, C_in, win).  Under jit the
    # downsample + pad + unfold + bf16 cast fuse into one gather pass.
    # TODO(synk): at large C_in, replace the unfold with in-kernel windows
    # (memory_space=pl.ANY + pltpu.make_async_copy over pl.ds) to drop it fully.
    x_pad = jnp.pad(x_ds, ((0, 0), (0, 0), (_HALO, _HALO + size_p - size)))
    cols = np.arange(n_t)[:, None] * tile_t + np.arange(win)[None, :]
    x_win = jnp.moveaxis(x_pad[:, :, cols], 2, 1).reshape(B * n_t, C_in, win)

    # Fuse taps only when the channel count is bf16 sublane-aligned.
    fuse0 = (C_in % 16 == 0)
    fuse12 = (H % 16 == 0)

    flops = 2 * B * size_p * (4 * C_in * H + 6 * H * H)
    bytes_accessed = (2 * B * n_t * C_in * win + 4 * B * H * size_p
                      + 2 * (4 * C_in * H + 6 * H * H) + 16 * H)

    kernel = pl.pallas_call(
        functools.partial(dblock_kernel, tile_t=tile_t, size=size,
                          fuse0=fuse0, fuse12=fuse12),
        out_shape=jax.ShapeDtypeStruct((B, H, size_p), jnp.float32),
        grid=(B, n_t),
        in_specs=[
            pl.BlockSpec((None, C_in, win), lambda b, t: (b * n_t + t, 0, 0)),
            pl.BlockSpec((H, C_in), lambda b, t: (0, 0)),
            pl.BlockSpec((H, 1), lambda b, t: (0, 0)),
            pl.BlockSpec((H, 3 * C_in), lambda b, t: (0, 0)),
            pl.BlockSpec((H, 1), lambda b, t: (0, 0)),
            pl.BlockSpec((H, 3 * H), lambda b, t: (0, 0)),
            pl.BlockSpec((H, 1), lambda b, t: (0, 0)),
            pl.BlockSpec((H, 3 * H), lambda b, t: (0, 0)),
            pl.BlockSpec((H, 1), lambda b, t: (0, 0)),
        ],
        out_specs=pl.BlockSpec((None, H, tile_t), lambda b, t: (b, 0, t)),
        compiler_params=pltpu.CompilerParams(
            dimension_semantics=("parallel", "parallel"),
            vmem_limit_bytes=32 * 1024 * 1024),
        cost_estimate=pl.CostEstimate(flops=int(flops), transcendentals=0,
                                      bytes_accessed=int(bytes_accessed)),
    )
    y = kernel(x_win,
               params["w_res"], params["b_res"],
               params["w0"], params["b0"],
               params["w1"], params["b1"],
               params["w2"], params["b2"])
    return y if size_p == size else y[:, :, :size]       # (B, H, size), NCT


# ----------------------- deterministic parameter init -----------------------

def orthogonal(key, shape):
    """Deterministic orthogonal init (QR), analogous to nn.init.orthogonal_."""
    rows = shape[0]
    cols = int(np.prod(shape[1:]))
    n, m = max(rows, cols), min(rows, cols)
    a = jax.random.normal(key, (n, m), dtype=jnp.float32)
    q, r = jnp.linalg.qr(a)
    q = q * jnp.sign(jnp.diagonal(r))[None, :]
    if rows < cols:
        q = q.T
    return q.reshape(shape)


def init_params(key, input_size, hidden_size):
    ks = jax.random.split(key, 4)
    # torch Conv1d weight layout: (out_channels, in_channels, kernel_size)
    w_res_t = orthogonal(ks[0], (hidden_size, input_size, 1))
    w0_t = orthogonal(ks[1], (hidden_size, input_size, 3))
    w1_t = orthogonal(ks[2], (hidden_size, hidden_size, 3))
    w2_t = orthogonal(ks[3], (hidden_size, hidden_size, 3))

    def fuse(w):  # (O, I, 3) -> (O, 3I) bf16: [tap0 | tap1 | tap2]
        return jnp.concatenate([w[:, :, 0], w[:, :, 1], w[:, :, 2]],
                               axis=1).astype(jnp.bfloat16)

    def zbias():
        return jnp.zeros((hidden_size, 1), jnp.float32)

    return {
        "w_res": w_res_t[:, :, 0].astype(jnp.bfloat16), "b_res": zbias(),
        "w0": fuse(w0_t), "b0": zbias(),
        "w1": fuse(w1_t), "b1": zbias(),
        "w2": fuse(w2_t), "b2": zbias(),
        "_torch": (w_res_t, w0_t, w1_t, w2_t),  # for the pure-JAX reference
    }


# ------------------------------ pure-JAX reference ---------------------------

def _ref_conv1d(x, w, dilation, padding):
    hp = lax.Precision.HIGHEST
    return lax.conv_general_dilated(
        x, w, window_strides=(1,), padding=[(padding, padding)],
        rhs_dilation=(dilation,), dimension_numbers=("NCH", "OIH", "NCH"),
        precision=hp)  # biases are zero (Conv1d.reset_parameters)


def ref_forward(x, params, factor):
    w_res_t, w0_t, w1_t, w2_t = params["_torch"]
    B, C, T = x.shape
    size = T // factor
    idx = (jnp.arange(size) * T) // size
    res = _ref_conv1d(x, w_res_t, 1, 0)[:, :, idx]
    h = x[:, :, idx]
    for w, d in ((w0_t, 1), (w1_t, 2), (w2_t, 4)):
        h = jnp.where(h >= 0, h, 0.2 * h)
        h = _ref_conv1d(h, w, d, d)
    return h + res


# ------------------------------------ main -----------------------------------

if __name__ == "__main__":
    key = jax.random.PRNGKey(0)
    k_x1, k_x2, k_p = jax.random.split(key, 3)

    B, C_in, H = 2, 4, 32
    params = init_params(k_p, C_in, H)

    # Case 1: small single-tile sequence (T=16, factor=2 -> size=8).
    x1 = jax.random.normal(k_x1, (B, C_in, 16), dtype=jnp.float32)
    out1 = jax.block_until_ready(dblock_forward(x1, params, factor=2))
    ref1 = jax.block_until_ready(ref_forward(x1, params, factor=2))
    assert out1.shape == (B, H, 8)
    # bf16 inputs/weights (f32 accumulation) vs f32-HIGHEST reference.
    np.testing.assert_allclose(np.asarray(out1), np.asarray(ref1),
                               rtol=5e-2, atol=5e-2)

    # Case 2: multi-tile path (3 time tiles of 128) — exercises inter-tile halo
    # handling, boundary masking and the fused-tap matmuls.
    x2 = jax.random.normal(k_x2, (B, C_in, 768), dtype=jnp.float32)
    out2 = jax.block_until_ready(dblock_forward(x2, params, factor=2,
                                                max_tile=128))
    ref2 = jax.block_until_ready(ref_forward(x2, params, factor=2))
    assert out2.shape == (B, H, 384)
    np.testing.assert_allclose(np.asarray(out2), np.asarray(ref2),
                               rtol=5e-2, atol=5e-2)

    print("KERNEL_OK")
</pallas_src>

<mosaic_0001>
module attributes {stable_mosaic.version = 11 : i64} {
  func.func @dblock_kernel(%arg0: i32, %arg1: i32, %arg2: memref<1x4x22xbf16, #tpu.memory_space<vmem>>, %arg3: memref<32x4xbf16, #tpu.memory_space<vmem>>, %arg4: memref<32x1xf32, #tpu.memory_space<vmem>>, %arg5: memref<32x12xbf16, #tpu.memory_space<vmem>>, %arg6: memref<32x1xf32, #tpu.memory_space<vmem>>, %arg7: memref<32x96xbf16, #tpu.memory_space<vmem>>, %arg8: memref<32x1xf32, #tpu.memory_space<vmem>>, %arg9: memref<32x96xbf16, #tpu.memory_space<vmem>>, %arg10: memref<32x1xf32, #tpu.memory_space<vmem>>, %arg11: memref<1x32x8xf32, #tpu.memory_space<vmem>>) attributes {dimension_semantics = [#tpu.dimension_semantics<parallel>, #tpu.dimension_semantics<parallel>], iteration_bounds = array<i64: 2, 1>, scalar_prefetch = 0 : i64, scratch_operands = 0 : i64, tpu.core_type = #tpu.core_type<tc>, window_params = [{transform_indices = @transform_0, window_bounds = array<i64: 1, 4, 22>}, {pipeline_mode = #tpu.pipeline_mode<synchronous>, transform_indices = @transform_1, window_bounds = array<i64: 32, 4>}, {pipeline_mode = #tpu.pipeline_mode<synchronous>, transform_indices = @transform_2, window_bounds = array<i64: 32, 1>}, {pipeline_mode = #tpu.pipeline_mode<synchronous>, transform_indices = @transform_3, window_bounds = array<i64: 32, 12>}, {pipeline_mode = #tpu.pipeline_mode<synchronous>, transform_indices = @transform_4, window_bounds = array<i64: 32, 1>}, {pipeline_mode = #tpu.pipeline_mode<synchronous>, transform_indices = @transform_5, window_bounds = array<i64: 32, 96>}, {pipeline_mode = #tpu.pipeline_mode<synchronous>, transform_indices = @transform_6, window_bounds = array<i64: 32, 1>}, {pipeline_mode = #tpu.pipeline_mode<synchronous>, transform_indices = @transform_7, window_bounds = array<i64: 32, 96>}, {pipeline_mode = #tpu.pipeline_mode<synchronous>, transform_indices = @transform_8, window_bounds = array<i64: 32, 1>}, {transform_indices = @transform_9, window_bounds = array<i64: 1, 32, 8>}]} {
    %c8_i32 = arith.constant 8 : i32
    %0 = arith.muli %arg1, %c8_i32 : i32
    %c7_i32 = arith.constant 7 : i32
    %1 = arith.subi %0, %c7_i32 : i32
    %c0 = arith.constant 0 : index
    %c0_0 = arith.constant 0 : index
    %c0_1 = arith.constant 0 : index
    %2 = vector.load %arg2[%c0, %c0_0, %c0_1] : memref<1x4x22xbf16, #tpu.memory_space<vmem>>, vector<1x4x22xbf16>
    %3 = vector.shape_cast %2 : vector<1x4x22xbf16> to vector<4x22xbf16>
    %4 = tpu.iota {dimensions = array<i32: 1>} : vector<1x22xi32>
    %5 = vector.broadcast %1 : i32 to vector<1x22xi32>
    %6 = arith.addi %5, %4 : vector<1x22xi32>
    %c0_i32 = arith.constant 0 : i32
    %7 = vector.broadcast %c0_i32 : i32 to vector<1x22xi32>
    %8 = arith.cmpi sge, %6, %7 : vector<1x22xi32>
    %c8_i32_2 = arith.constant 8 : i32
    %9 = vector.broadcast %c8_i32_2 : i32 to vector<1x22xi32>
    %10 = arith.cmpi slt, %6, %9 : vector<1x22xi32>
    %11 = arith.andi %8, %10 : vector<1x22xi1>
    %12 = arith.extui %11 : vector<1x22xi1> to vector<1x22xi32>
    %13 = arith.sitofp %12 : vector<1x22xi32> to vector<1x22xf32>
    %c0_3 = arith.constant 0 : index
    %c0_4 = arith.constant 0 : index
    %14 = vector.load %arg3[%c0_3, %c0_4] : memref<32x4xbf16, #tpu.memory_space<vmem>>, vector<32x4xbf16>
    %15 = vector.extract_strided_slice %3 {offsets = [0, 7], sizes = [4, 8], strides = [1, 1]} : vector<4x22xbf16> to vector<4x8xbf16>
    %cst = arith.constant dense<0.000000e+00> : vector<32x8xf32>
    %16 = tpu.matmul %14, %15, %cst {dimension_numbers = #tpu.dot_dimension_numbers<[1], [0], [0], [1], [0, 0, 1, 1], [], []>} : vector<32x4xbf16>, vector<4x8xbf16>, vector<32x8xf32> -> vector<32x8xf32>
    %c0_5 = arith.constant 0 : index
    %c0_6 = arith.constant 0 : index
    %17 = vector.load %arg4[%c0_5, %c0_6] : memref<32x1xf32, #tpu.memory_space<vmem>>, vector<32x1xf32>
    %18 = vector.broadcast %17 : vector<32x1xf32> to vector<32x8xf32>
    %19 = arith.addf %16, %18 : vector<32x8xf32>
    %cst_7 = arith.constant 2.001950e-01 : bf16
    %20 = vector.broadcast %cst_7 : bf16 to vector<4x22xbf16>
    %21 = arith.mulf %20, %3 : vector<4x22xbf16>
    %22 = arith.maximumf %3, %21 : vector<4x22xbf16>
    %c0_8 = arith.constant 0 : index
    %c0_9 = arith.constant 0 : index
    %23 = vector.load %arg5[%c0_8, %c0_9] : memref<32x12xbf16, #tpu.memory_space<vmem>>, vector<32x12xbf16>
    %24 = vector.extract_strided_slice %23 {offsets = [0, 0], sizes = [32, 4], strides = [1, 1]} : vector<32x12xbf16> to vector<32x4xbf16>
    %25 = vector.extract_strided_slice %22 {offsets = [0, 0], sizes = [4, 20], strides = [1, 1]} : vector<4x22xbf16> to vector<4x20xbf16>
    %cst_10 = arith.constant dense<0.000000e+00> : vector<32x20xf32>
    %26 = tpu.matmul %24, %25, %cst_10 {dimension_numbers = #tpu.dot_dimension_numbers<[1], [0], [0], [1], [0, 0, 1, 1], [], []>} : vector<32x4xbf16>, vector<4x20xbf16>, vector<32x20xf32> -> vector<32x20xf32>
    %27 = vector.extract_strided_slice %23 {offsets = [0, 4], sizes = [32, 4], strides = [1, 1]} : vector<32x12xbf16> to vector<32x4xbf16>
    %28 = vector.extract_strided_slice %22 {offsets = [0, 1], sizes = [4, 20], strides = [1, 1]} : vector<4x22xbf16> to vector<4x20xbf16>
    %cst_11 = arith.constant dense<0.000000e+00> : vector<32x20xf32>
    %29 = tpu.matmul %27, %28, %cst_11 {dimension_numbers = #tpu.dot_dimension_numbers<[1], [0], [0], [1], [0, 0, 1, 1], [], []>} : vector<32x4xbf16>, vector<4x20xbf16>, vector<32x20xf32> -> vector<32x20xf32>
    %30 = arith.addf %26, %29 : vector<32x20xf32>
    %31 = vector.extract_strided_slice %23 {offsets = [0, 8], sizes = [32, 4], strides = [1, 1]} : vector<32x12xbf16> to vector<32x4xbf16>
    %32 = vector.extract_strided_slice %22 {offsets = [0, 2], sizes = [4, 20], strides = [1, 1]} : vector<4x22xbf16> to vector<4x20xbf16>
    %cst_12 = arith.constant dense<0.000000e+00> : vector<32x20xf32>
    %33 = tpu.matmul %31, %32, %cst_12 {dimension_numbers = #tpu.dot_dimension_numbers<[1], [0], [0], [1], [0, 0, 1, 1], [], []>} : vector<32x4xbf16>, vector<4x20xbf16>, vector<32x20xf32> -> vector<32x20xf32>
    %34 = arith.addf %30, %33 : vector<32x20xf32>
    %c0_13 = arith.constant 0 : index
    %c0_14 = arith.constant 0 : index
    %35 = vector.load %arg6[%c0_13, %c0_14] : memref<32x1xf32, #tpu.memory_space<vmem>>, vector<32x1xf32>
    %36 = vector.broadcast %35 : vector<32x1xf32> to vector<32x20xf32>
    %37 = arith.addf %34, %36 : vector<32x20xf32>
    %cst_15 = arith.constant 2.000000e-01 : f32
    %38 = vector.broadcast %cst_15 : f32 to vector<32x20xf32>
    %39 = arith.mulf %38, %37 : vector<32x20xf32>
    %40 = arith.maximumf %37, %39 : vector<32x20xf32>
    %41 = vector.extract_strided_slice %13 {offsets = [0, 1], sizes = [1, 20], strides = [1, 1]} : vector<1x22xf32> to vector<1x20xf32>
    %42 = vector.broadcast %41 : vector<1x20xf32> to vector<32x20xf32>
    %43 = arith.mulf %40, %42 : vector<32x20xf32>
    %44 = arith.truncf %43 : vector<32x20xf32> to vector<32x20xbf16>
    %c0_16 = arith.constant 0 : index
    %c0_17 = arith.constant 0 : index
    %45 = vector.load %arg7[%c0_16, %c0_17] : memref<32x96xbf16, #tpu.memory_space<vmem>>, vector<32x96xbf16>
    %46 = vector.extract_strided_slice %44 {offsets = [0, 0], sizes = [32, 16], strides = [1, 1]} : vector<32x20xbf16> to vector<32x16xbf16>
    %47 = vector.extract_strided_slice %44 {offsets = [0, 2], sizes = [32, 16], strides = [1, 1]} : vector<32x20xbf16> to vector<32x16xbf16>
    %48 = vector.extract_strided_slice %44 {offsets = [0, 4], sizes = [32, 16], strides = [1, 1]} : vector<32x20xbf16> to vector<32x16xbf16>
    %49 = tpu.concatenate %46, %47, %48 in 0 : vector<32x16xbf16>, vector<32x16xbf16>, vector<32x16xbf16> -> vector<96x16xbf16>
    %cst_18 = arith.constant dense<0.000000e+00> : vector<32x16xf32>
    %50 = tpu.matmul %45, %49, %cst_18 {dimension_numbers = #tpu.dot_dimension_numbers<[1], [0], [0], [1], [0, 0, 1, 1], [], []>} : vector<32x96xbf16>, vector<96x16xbf16>, vector<32x16xf32> -> vector<32x16xf32>
    %c0_19 = arith.constant 0 : index
    %c0_20 = arith.constant 0 : index
    %51 = vector.load %arg8[%c0_19, %c0_20] : memref<32x1xf32, #tpu.memory_space<vmem>>, vector<32x1xf32>
    %52 = vector.broadcast %51 : vector<32x1xf32> to vector<32x16xf32>
    %53 = arith.addf %50, %52 : vector<32x16xf32>
    %cst_21 = arith.constant 2.000000e-01 : f32
    %54 = vector.broadcast %cst_21 : f32 to vector<32x16xf32>
    %55 = arith.mulf %54, %53 : vector<32x16xf32>
    %56 = arith.maximumf %53, %55 : vector<32x16xf32>
    %57 = vector.extract_strided_slice %13 {offsets = [0, 3], sizes = [1, 16], strides = [1, 1]} : vector<1x22xf32> to vector<1x16xf32>
    %58 = vector.broadcast %57 : vector<1x16xf32> to vector<32x16xf32>
    %59 = arith.mulf %56, %58 : vector<32x16xf32>
    %60 = arith.truncf %59 : vector<32x16xf32> to vector<32x16xbf16>
    %c0_22 = arith.constant 0 : index
    %c0_23 = arith.constant 0 : index
    %61 = vector.load %arg9[%c0_22, %c0_23] : memref<32x96xbf16, #tpu.memory_space<vmem>>, vector<32x96xbf16>
    %62 = vector.extract_strided_slice %60 {offsets = [0, 0], sizes = [32, 8], strides = [1, 1]} : vector<32x16xbf16> to vector<32x8xbf16>
    %63 = vector.extract_strided_slice %60 {offsets = [0, 4], sizes = [32, 8], strides = [1, 1]} : vector<32x16xbf16> to vector<32x8xbf16>
    %64 = vector.extract_strided_slice %60 {offsets = [0, 8], sizes = [32, 8], strides = [1, 1]} : vector<32x16xbf16> to vector<32x8xbf16>
    %65 = tpu.concatenate %62, %63, %64 in 0 : vector<32x8xbf16>, vector<32x8xbf16>, vector<32x8xbf16> -> vector<96x8xbf16>
    %cst_24 = arith.constant dense<0.000000e+00> : vector<32x8xf32>
    %66 = tpu.matmul %61, %65, %cst_24 {dimension_numbers = #tpu.dot_dimension_numbers<[1], [0], [0], [1], [0, 0, 1, 1], [], []>} : vector<32x96xbf16>, vector<96x8xbf16>, vector<32x8xf32> -> vector<32x8xf32>
    %c0_25 = arith.constant 0 : index
    %c0_26 = arith.constant 0 : index
    %67 = vector.load %arg10[%c0_25, %c0_26] : memref<32x1xf32, #tpu.memory_space<vmem>>, vector<32x1xf32>
    %68 = vector.broadcast %67 : vector<32x1xf32> to vector<32x8xf32>
    %69 = arith.addf %66, %68 : vector<32x8xf32>
    %70 = arith.addf %69, %19 : vector<32x8xf32>
    %c0_27 = arith.constant 0 : index
    %c0_28 = arith.constant 0 : index
    %c0_29 = arith.constant 0 : index
    %71 = vector.load %arg11[%c0_27, %c0_28, %c0_29] : memref<1x32x8xf32, #tpu.memory_space<vmem>>, vector<1x32x8xf32>
    %72 = vector.shape_cast %71 : vector<1x32x8xf32> to vector<32x8xf32>
    %73 = vector.shape_cast %70 : vector<32x8xf32> to vector<1x32x8xf32>
    tpu.vector_store %arg11[%c0_27, %c0_28, %c0_29], %73 {strides = array<i32>} : memref<1x32x8xf32, #tpu.memory_space<vmem>>, vector<1x32x8xf32>,
    return
  }
  func.func @transform_0(%arg0: i32, %arg1: i32) -> (i32, i32, i32) {
    %c1_i32 = arith.constant 1 : i32
    %0 = arith.muli %arg0, %c1_i32 : i32
    %1 = arith.addi %0, %arg1 : i32
    %c0_i32 = arith.constant 0 : i32
    %c0_i32_0 = arith.constant 0 : i32
    %c0_i32_1 = arith.constant 0 : i32
    return %1, %c0_i32, %c0_i32_0 : i32, i32, i32
  }
  func.func @transform_1(%arg0: i32, %arg1: i32) -> (i32, i32) {
    %c0_i32 = arith.constant 0 : i32
    %c0_i32_0 = arith.constant 0 : i32
    %c0_i32_1 = arith.constant 0 : i32
    return %c0_i32, %c0_i32_0 : i32, i32
  }
  func.func @transform_2(%arg0: i32, %arg1: i32) -> (i32, i32) {
    %c0_i32 = arith.constant 0 : i32
    %c0_i32_0 = arith.constant 0 : i32
    %c0_i32_1 = arith.constant 0 : i32
    return %c0_i32, %c0_i32_0 : i32, i32
  }
  func.func @transform_3(%arg0: i32, %arg1: i32) -> (i32, i32) {
    %c0_i32 = arith.constant 0 : i32
    %c0_i32_0 = arith.constant 0 : i32
    %c0_i32_1 = arith.constant 0 : i32
    return %c0_i32, %c0_i32_0 : i32, i32
  }
  func.func @transform_4(%arg0: i32, %arg1: i32) -> (i32, i32) {
    %c0_i32 = arith.constant 0 : i32
    %c0_i32_0 = arith.constant 0 : i32
    %c0_i32_1 = arith.constant 0 : i32
    return %c0_i32, %c0_i32_0 : i32, i32
  }
  func.func @transform_5(%arg0: i32, %arg1: i32) -> (i32, i32) {
    %c0_i32 = arith.constant 0 : i32
    %c0_i32_0 = arith.constant 0 : i32
    %c0_i32_1 = arith.constant 0 : i32
    return %c0_i32, %c0_i32_0 : i32, i32
  }
  func.func @transform_6(%arg0: i32, %arg1: i32) -> (i32, i32) {
    %c0_i32 = arith.constant 0 : i32
    %c0_i32_0 = arith.constant 0 : i32
    %c0_i32_1 = arith.constant 0 : i32
    return %c0_i32, %c0_i32_0 : i32, i32
  }
  func.func @transform_7(%arg0: i32, %arg1: i32) -> (i32, i32) {
    %c0_i32 = arith.constant 0 : i32
    %c0_i32_0 = arith.constant 0 : i32
    %c0_i32_1 = arith.constant 0 : i32
    return %c0_i32, %c0_i32_0 : i32, i32
  }
  func.func @transform_8(%arg0: i32, %arg1: i32) -> (i32, i32) {
    %c0_i32 = arith.constant 0 : i32
    %c0_i32_0 = arith.constant 0 : i32
    %c0_i32_1 = arith.constant 0 : i32
    return %c0_i32, %c0_i32_0 : i32, i32
  }
  func.func @transform_9(%arg0: i32, %arg1: i32) -> (i32, i32, i32) {
    %c0_i32 = arith.constant 0 : i32
    %c0_i32_0 = arith.constant 0 : i32
    return %arg0, %c0_i32, %arg1 : i32, i32, i32
  }
}

</mosaic_0001>

<bundles_post_ra>
// kernel: dblock_forward.1
= control target key start
LH: loop header
LB: loop body
LE: loop exit
PB: predicated region body
PF: predicated region fallthrough
CT: control target
= control target key end

     0   :  { %s1323_s30 = smov 0   ;;  %s1325_s10 = smov 0   ;;  %s1469_s0 = inlined_call_operand.vmem [shape: bf16[2,4,22], index: 0, kind: input, shape index: {}]   ;;  %s1470_s1 = inlined_call_operand.vmem [shape: bf16[32,4], index: 1, kind: input, shape index: {}]   ;;  %s1471_s2 = inlined_call_operand.vmem [shape: f32[32,1], index: 2, kind: input, shape index: {}]   ;;  %s1472_s3 = inlined_call_operand.vmem [shape: bf16[32,12], index: 3, kind: input, shape index: {}]   ;;  %s1473_s4 = inlined_call_operand.vmem [shape: f32[32,1], index: 4, kind: input, shape index: {}]   ;;  %s1474_s5 = inlined_call_operand.vmem [shape: bf16[32,96], index: 5, kind: input, shape index: {}]   ;;  %s1475_s6 = inlined_call_operand.vmem [shape: f32[32,1], index: 6, kind: input, shape index: {}]   ;;  %s1476_s7 = inlined_call_operand.vmem [shape: bf16[32,96], index: 7, kind: input, shape index: {}]   ;;  %s1477_s8 = inlined_call_operand.vmem [shape: f32[32,1], index: 8, kind: input, shape index: {}]   ;;  %s1478_s9 = inlined_call_operand.vmem [shape: f32[2,32,8], index: 9, kind: output, shape index: {}]  }
   0x1   :  { %s1327_s11 = smov 0  }
   0x2 LB: > { %s31_s12 = sadd.s32 1, %s1258_s10  ;;  %p1061_p0 = scmp.ge.s32.totalorder %s1262_s11, 1  ;;  %s1262_s11 = sphi %s1327_s11, %s19_s11   ;;  %s1258_s10 = sphi %s1325_s10, %s1480_s10   ;;  %s1254_s30 = sphi %s1323_s30, %s1479_s30  }
   0x3   : > { %p33_p1 = scmp.ge.s32.totalorder %s31_s12, 2  ;;  %p304_p2 = scmp.lt.s32.totalorder %s1262_s11, 3 }
   0x5   : > { %s1482_s12 = smov (%p33_p1, %s31_s12), 0  ;;  %p305_p3 = pnand %p1061_p0, %p304_p2 }
   0x6   : > { %v1232_v0 = vld [vmem:[%s1472_s3] sm:$0xff] (!%p305_p3)   ;;  %v362_v1 = vlaneseq (!%p305_p3)  ;;  %p344_p4 = scmp.lt.s32.totalorder (!%p305_p3), %s1254_s30, 1  ;;  %s1264_s15 = smov (!%p305_p3), 124   ;;  %v1265_v2 = vmov (!%p305_p3), 1983009808   ;;  %vm419_vm0 = vcmask (!%p305_p3), 31744  }
   0x7   : > { %308 = sbr.rel (%p305_p3) target bundleno = 1079 (0x437), region = 56  ;;  %495 = vrot.lane.b32.xlu1 (!%p305_p3), %v1232_v0, %s1264_s15  ;;  %v411_v3 = vunpack.c.l.s4 (!%p305_p3), %v1265_v2  ;;  %v1234_v5 = vld [vmem:[%s1470_s1] sm:$0xff] (!%p305_p3)   ;;  %1131 = vmatprep.mubr.msk.bf16.mxu1 (!%p305_p3), %vm419_vm0, %v1232_v0  ;;  %vm426_vm1 = vcmask (!%p305_p3), 1041408   ;;  %s1266_s22 = smov (!%p305_p3), 121   ;;  %v1267_v12 = vmov (!%p305_p3), 0   ;;  %v1233_v16 = vld [vmem:[%s1472_s3 + $0x8] sm:$0xff] (!%p305_p3)  }
   0x8   : > { %v414_v4 = vshrl.u32 (!%p305_p3), %v362_v1, 7  ;;  %1119 = vmatprep.mubr.msk.bf16.mxu0 (!%p305_p3), %vm419_vm0, %v1234_v5  ;;  %1230 = vset.pattern.permute.xlu1 (!%p305_p3), %v1267_v12  ;;  %v363_v15 = vand.u32 (!%p305_p3), 127, %v362_v1  ;;  %s1268_s23 = smov (!%p305_p3), 126   ;;  %s1269_s24 = smov (!%p305_p3), 120   ;;  %v693_v18 = vld [vmem:[%s1473_s4] sm:$0xff] (!%p305_p3)  ;;  %v695_v19 = vld [vmem:[%s1473_s4 + $0x10] sm:$0xff] (!%p305_p3) }
   0x9   : > { %v412_v6 = vunpack.c.0.s8 (!%p305_p3), %v411_v3  ;;  %1231 = vset.pattern.permute.xlu0 (!%p305_p3), %v1267_v12  ;;  %s1270_s27 = smov (!%p305_p3), 127   ;;  %v694_v20 = vld [vmem:[%s1473_s4 + $0x8] sm:$0xff] (!%p305_p3)  ;;  %v696_v21 = vld [vmem:[%s1473_s4 + $0x18] sm:$0xff] (!%p305_p3)  ;;  %v1271_v22 = vmov (!%p305_p3), 0.0   ;;  %vm791_vm5 = vcmask (!%p305_p3), 785408   ;;  %s1272_s17 = smov (!%p305_p3), 125  }
   0xa   : > { %v365_v17 = vadd.s32 (!%p305_p3), 4294967289, %v363_v15  ;;  %v1235_v27 = vld [vmem:[%s1470_s1 + $0x8] sm:$0xff] (!%p305_p3)   ;;  %vm975_vm6 = vcmask (!%p305_p3), 64512  }
   0xb   : > { %v415_v7 = vsub.s32 (!%p305_p3), %v412_v6, %v414_v4  ;;  %v1236_v6 = vld [vmem:[%s1474_s5] sm:$0xff] (!%p305_p3)   ;;  %v1237_v15 = vld [vmem:[%s1474_s5 + $0x8] sm:$0xff] (!%p305_p3)  }
   0xc   : > { %vm366_vm2 = vcmp.ge.s32.totalorder (!%p305_p3), %v365_v17, 0  ;;  %vm367_vm3 = vcmp.lt.s32.totalorder (!%p305_p3), %v365_v17, 8 }
   0xd   : > { %vm368_vm4 = vmand (!%p305_p3), %vm366_vm2, %vm367_vm3 }
   0xe   : > { %s1484_s30 = smov (!%p344_p4, %s1254_s30), 1  ;;  %v1378_v23 = vsel %vm368_vm4, 1.0, %v1271_v22 }
   0xf   : > { %s1062_s18 = sshll.u32 %s1484_s30, 1  ;;  %s1088_s25 = sshll.u32 %s1484_s30, 5 }
  0x10   : > { %s347_s21 = scalar_lea.vmem %s1469_s0, %s1062_s18 }
  0x11   : > { %v361_v8 = vld [vmem:[%s347_s21] sm:$0x3] }
  0x12   : > { %v416_v9 = vrot.slane %v361_v8, %v415_v7  ;;  %v479_v10 = vmul.bf16 1045249613, %v361_v8 }
  0x14   : > { %v480_v11 = vmax.bf16 %v479_v10, %v361_v8  ;;  %417 = vrot.lane.b32.xlu0 %v416_v9, %s1266_s22  ;;  %v757_v8 = vld [vmem:[%s1475_s6] sm:$0xff]  ;;  %v760_v9 = vld [vmem:[%s1475_s6 + $0x18] sm:$0xff]  ;;  %v759_v10 = vld [vmem:[%s1475_s6 + $0x10] sm:$0xff] }
  0x16   : > { %v506_v13 = vrot.slane %v480_v11, %v415_v7  ;;  %1195 = vmatprep.subr.msk.bf16.mxu1 %vm426_vm1, %v480_v11  ;;  %v574_v14 = vsel %vm426_vm1, %v480_v11, 0  ;;  %v758_v7 = vld [vmem:[%s1475_s6 + $0x8] sm:$0xff] }
  0x17   : > { %1130 = vmatpush3.bf16.msra.mxu1 %v574_v14 }
  0x18   : > { %629 = vrot.lane.b32.xlu1 %v506_v13, %s1268_s23  ;;  %625 = vrot.lane.b32.xlu0 %v1232_v0, %s1269_s24 }
  0x1a   : > { %1132 = vmatmul.mubr.msk.bf16.vlgmr.msra.gmra.mrb[0].mxu1 %vm419_vm0, %v1233_v16 }
  0x1c   : > { %507 = vrot.lane.b32.xlu0 %v506_v13, %s1270_s27  ;;  %497 = vrot.lane.b32.xlu1 %v1233_v16, %s1264_s15 }
  0x20   : > { %627 = vrot.lane.b32.xlu0 %v1233_v16, %s1269_s24  ;;  %699 = vperm.xlu1 %1230, %v693_v18  }
  0x24   : > { %709 = vperm.xlu1 %1230, %v695_v19   ;;  %704 = vperm.xlu0 %1231, %v694_v20  }
  0x28   : > { %714 = vperm.xlu1 %1230, %v696_v21   ;;  %730 = vrot.lane.b32.xlu0 %v1378_v23, %s1270_s27  ;;  %s356_s27 = scalar_lea.vmem %s1478_s9, %s1088_s25 }
  0x79   : > { %v496_v24 = vpop.permute.xlu1 %495 }
  0x86   : > { %v418_v25 = vpop.permute.xlu0 %417 }
  0x87   : > { %1193 = vmatprep.subr.msk.bf16.mxu0 %vm426_vm1, %v418_v25  ;;  %v428_v26 = vsel %vm426_vm1, %v418_v25, 0 }
  0x88   : > { %1118 = vmatpush3.bf16.msra.mxu0 %v428_v26 }
  0x8a   : > { %v630_v28 = vpop.permute.xlu1 %629  ;;  %v626_v29 = vpop.permute.xlu0 %625 }
  0x8b   : > { %v638_v30 = vsel %vm426_vm1, %v630_v28, 0  ;;  %1120 = vmatmul.mubr.msk.bf16.vlgmr.msra.gmra.mrb[0].mxu0 %vm419_vm0, %v1235_v27  ;;  %1196 = vmatprep.subr.msk.bf16.mxu1 %vm426_vm1, %v630_v28 }
  0x8c   : > { %1137 = vmatprep.mubr.msk.bf16.mxu1 %vm419_vm0, %v626_v29  ;;  %1125 = vmatprep.mubr.msk.bf16.mxu0 %vm419_vm0, %v496_v24 }
  0x8d   : > { %1136 = vmatpush3.bf16.msra.mxu1 %v638_v30 }
  0x8e   : > { %v508_v31 = vpop.permute.xlu0 %507  ;;  %v498_v33 = vpop.permute.xlu1 %497 }
  0x8f   : > { %v516_v32 = vsel %vm426_vm1, %v508_v31, 0  ;;  %1194 = vmatprep.subr.msk.bf16.mxu0 %vm426_vm1, %v508_v31 }
  0x90   : > { %1124 = vmatpush3.bf16.msra.mxu0 %v516_v32 }
  0x92   : > { %v628_v34 = vpop.permute.xlu0 %627 }
  0x93   : > { %1126 = vmatmul.mubr.msk.bf16.vlgmr.msra.gmra.mrb[4].mxu0 %vm419_vm0, %v498_v33  ;;  %1138 = vmatmul.mubr.msk.bf16.vlgmr.msra.gmra.mrb[0].mxu1 %vm419_vm0, %v628_v34 }
  0x94   : > { %1153 = vmatprep.mubr.msk.bf16.mxu1 %vm791_vm5, %v1236_v6 }
  0x9f   : > { %v700_v35 = vpop.permute.xlu1 %699 }
  0xa3   : > { %v710_v36 = vpop.permute.xlu1 %709  ;;  %v705_v37 = vpop.permute.xlu0 %704 }
  0xa7   : > { %v715_v52 = vpop.permute.xlu1 %714  ;;  %v731_v61 = vpop.permute.xlu0 %730 }
 0x166   : > { %v1127_v38 = vpop.f32.mrb[4].mxu0  ;;  %v1139_v39 = vpop.f32.mrb[0].mxu1 }
 0x167   : > { %v1181_v40 = vadd.f32 %v1139_v39, %v1127_v38  ;;  %v552_v41 = vpop.f32.mrb[5].mxu0  ;;  %v674_v42 = vpop.f32.mrb[1].mxu1 }
 0x168   : > { %v1182_v43 = vadd.f32 %v674_v42, %v552_v41  ;;  %v1128_v44 = vpop.f32.mrb[6].mxu0  ;;  %v1140_v45 = vpop.f32.mrb[2].mxu1 }
 0x169   : > { %v719_v46 = vadd.f32 %v1181_v40, %v710_v36  ;;  %v1183_v47 = vadd.f32 %v1140_v45, %v1128_v44  ;;  %v555_v48 = vpop.f32.mrb[7].mxu0  ;;  %v677_v49 = vpop.f32.mrb[3].mxu1  ;;  %v376_v44 = vld [vmem:[%s1471_s2 + $0x8] sm:$0xff]  ;;  %v375_v45 = vld [vmem:[%s1471_s2] sm:$0xff] }
 0x16a   : > { %v717_v50 = vadd.f32 %v1182_v43, %v700_v35  ;;  %v1184_v51 = vadd.f32 %v677_v49, %v555_v48  ;;  %v1238_v43 = vld [vmem:[%s1476_s7] sm:$0xff]   ;;  %v883_v48 = vld [vmem:[%s1477_s8 + $0x8] sm:$0xff] }
 0x16b   : > { %v723_v53 = vmul.f32 0.2, %v719_v46  ;;  %v720_v54 = vadd.f32 %v1183_v47, %v715_v52  ;;  %1169 = vmatprep.mubr.msk.bf16.mxu0 %vm791_vm5, %v1238_v43  ;;  %v377_v47 = vld [vmem:[%s1471_s2 + $0x10] sm:$0xff]  ;;  %v882_v49 = vld [vmem:[%s1477_s8] sm:$0xff] }
 0x16c   : > { %v721_v55 = vmul.f32 0.2, %v717_v50  ;;  %v718_v56 = vadd.f32 %v1184_v51, %v705_v37  ;;  %v884_v51 = vld [vmem:[%s1477_s8 + $0x10] sm:$0xff] }
 0x16d   : > { %v727_v57 = vmax.f32 %v719_v46, %v723_v53  ;;  %v724_v58 = vmul.f32 0.2, %v720_v54  ;;  %v378_v46 = vld [vmem:[%s1471_s2 + $0x18] sm:$0xff] }
 0x16e   : > { %v725_v59 = vmax.f32 %v717_v50, %v721_v55  ;;  %v722_v60 = vmul.f32 0.2, %v718_v56  ;;  %v885_v50 = vld [vmem:[%s1477_s8 + $0x18] sm:$0xff] }
 0x16f   : > { %v728_v62 = vmax.f32 %v720_v54, %v724_v58  ;;  %v735_v0 = vmul.f32 %v731_v61, %v727_v57 }
 0x170   : > { %v726_v63 = vmax.f32 %v718_v56, %v722_v60  ;;  %v733_v2 = vmul.f32 %v731_v61, %v725_v59  ;;  %v1239_v56 = vld [vmem:[%s1476_s7 + $0x8] sm:$0xff]  }
 0x171   : > { %v736_v1 = vmul.f32 %v731_v61, %v728_v62 }
 0x172   : > { %v734_v3 = vmul.f32 %v731_v61, %v726_v63 }
 0x173   : > { %v738_v4 = vpack.c.bf16 %v736_v1, %v735_v0 }
 0x174   : > { %v737_v5 = vpack.c.bf16 %v734_v3, %v733_v2 }
 0x175   : > { %747 = vrot.lane.b32.xlu0 %v738_v4, %s1268_s23 }
 0x176   : > { %745 = vrot.lane.b32.xlu1 %v737_v5, %s1268_s23  ;;  %1141 = vmatprep.subr.bf16.mxu1 %v737_v5 }
 0x177   : > { %1142 = vmatpush3.bf16.msra.mxu1 %v737_v5 }
 0x178   : > { %1143 = vmatprep.subr.bf16.mxu1 %v738_v4 }
 0x179   : > { %753 = vrot.lane.b32.xlu0 %v738_v4, %s1264_s15 }
 0x17a   : > { %751 = vrot.lane.b32.xlu1 %v737_v5, %s1264_s15 }
 0x17b   : > { %1144 = vmatpush3.bf16.msra.mxu1 %v738_v4 }
 0x17d   : > { %768 = vperm.xlu0 %1231, %v758_v7  }
 0x17e   : > { %763 = vperm.xlu1 %1230, %v757_v8  }
 0x181   : > { %778 = vperm.xlu0 %1231, %v760_v9  }
 0x182   : > { %773 = vperm.xlu1 %1230, %v759_v10  }
 0x186   : > { %855 = vrot.lane.b32.xlu1 %v1378_v23, %s1272_s17 }
 0x1e7   : > { %v748_v12 = vpop.permute.xlu0 %747 }
 0x1e8   : > { %v746_v11 = vpop.permute.xlu1 %745 }
 0x1e9   : > { %1145 = vmatprep.subr.bf16.mxu1 %v746_v11 }
 0x1ea   : > { %1146 = vmatpush3.bf16.msra.mxu1 %v746_v11 }
 0x1eb   : > { %1147 = vmatprep.subr.bf16.mxu1 %v748_v12  ;;  %v754_v14 = vpop.permute.xlu0 %753 }
 0x1ec   : > { %v752_v13 = vpop.permute.xlu1 %751 }
 0x1ee   : > { %1148 = vmatpush3.bf16.msra.mxu1 %v748_v12 }
 0x1ef   : > { %1149 = vmatprep.subr.bf16.mxu1 %v752_v13 }
 0x1f2   : > { %1150 = vmatpush3.bf16.msra.mxu1 %v752_v13 }
 0x1f3   : > { %1151 = vmatprep.subr.bf16.mxu1 %v754_v14 }
 0x1f6   : > { %1152 = vmatpush3.bf16.msra.mxu1 %v754_v14 }
 0x1f9   : > { %1154 = vmatmul.mubr.msk.bf16.vlgmr.msra.gmra.mrb[4].mxu1 %vm791_vm5, %v1237_v15 }
 0x1fc   : > { %v769_v17 = vpop.permute.xlu0 %768 }
 0x1fd   : > { %v764_v16 = vpop.permute.xlu1 %763 }
 0x200   : > { %v779_v22 = vpop.permute.xlu0 %778 }
 0x201   : > { %v774_v18 = vpop.permute.xlu1 %773 }
 0x205   : > { %v856_v34 = vpop.permute.xlu1 %855 }
 0x2cc   : > { %v1155_v19 = vpop.f32.mrb[4].mxu1 }
 0x2cd   : > { %v841_v20 = vadd.f32 %v1155_v19, %v774_v18  ;;  %v832_v21 = vpop.f32.mrb[5].mxu1 }
 0x2ce   : > { %v833_v23 = vadd.f32 %v832_v21, %v764_v16  ;;  %v1156_v24 = vpop.f32.mrb[6].mxu1 }
 0x2cf   : > { %v849_v25 = vmul.f32 0.2, %v841_v20  ;;  %v844_v26 = vadd.f32 %v1156_v24, %v779_v22  ;;  %v835_v27 = vpop.f32.mrb[7].mxu1 }
 0x2d0   : > { %v847_v28 = vmul.f32 0.2, %v833_v23  ;;  %v836_v29 = vadd.f32 %v835_v27, %v769_v17 }
 0x2d1   : > { %v853_v30 = vmax.f32 %v841_v20, %v849_v25  ;;  %v850_v31 = vmul.f32 0.2, %v844_v26 }
 0x2d2   : > { %v851_v32 = vmax.f32 %v833_v23, %v847_v28  ;;  %v848_v33 = vmul.f32 0.2, %v836_v29 }
 0x2d3   : > { %v854_v35 = vmax.f32 %v844_v26, %v850_v31  ;;  %v860_v37 = vmul.f32 %v856_v34, %v853_v30 }
 0x2d4   : > { %v852_v36 = vmax.f32 %v836_v29, %v848_v33  ;;  %v858_v39 = vmul.f32 %v856_v34, %v851_v32 }
 0x2d5   : > { %v861_v38 = vmul.f32 %v856_v34, %v854_v35 }
 0x2d6   : > { %v859_v40 = vmul.f32 %v856_v34, %v852_v36 }
 0x2d7   : > { %v863_v41 = vpack.c.bf16 %v861_v38, %v860_v37 }
 0x2d8   : > { %v862_v42 = vpack.c.bf16 %v859_v40, %v858_v39 }
 0x2d9   : > { %872 = vrot.lane.b32.xlu1 %v863_v41, %s1264_s15 }
 0x2da   : > { %870 = vrot.lane.b32.xlu0 %v862_v42, %s1264_s15  ;;  %1157 = vmatprep.subr.bf16.mxu0 %v862_v42 }
 0x2db   : > { %1158 = vmatpush3.bf16.msra.mxu0 %v862_v42 }
 0x2dc   : > { %1159 = vmatprep.subr.bf16.mxu0 %v863_v41 }
 0x2dd   : > { %878 = vrot.lane.b32.xlu1 %v863_v41, %s1269_s24 }
 0x2de   : > { %876 = vrot.lane.b32.xlu0 %v862_v42, %s1269_s24 }
 0x2df   : > { %1160 = vmatpush3.bf16.msra.mxu0 %v863_v41 }
 0x2e1   : > { %386 = vperm.xlu1 %1230, %v376_v44  }
 0x2e2   : > { %381 = vperm.xlu0 %1231, %v375_v45  }
 0x2e5   : > { %396 = vperm.xlu1 %1230, %v378_v46  }
 0x2e6   : > { %391 = vperm.xlu0 %1231, %v377_v47  }
 0x2e9   : > { %893 = vperm.xlu1 %1230, %v883_v48  }
 0x2ea   : > { %888 = vperm.xlu0 %1231, %v882_v49  }
 0x2ed   : > { %903 = vperm.xlu1 %1230, %v885_v50  }
 0x2ee   : > { %898 = vperm.xlu0 %1231, %v884_v51  }
 0x34b   : > { %v873_v53 = vpop.permute.xlu1 %872 }
 0x34c   : > { %v871_v52 = vpop.permute.xlu0 %870 }
 0x34d   : > { %1161 = vmatprep.subr.bf16.mxu0 %v871_v52 }
 0x34e   : > { %1162 = vmatpush3.bf16.msra.mxu0 %v871_v52 }
 0x34f   : > { %1163 = vmatprep.subr.bf16.mxu0 %v873_v53  ;;  %v879_v55 = vpop.permute.xlu1 %878 }
 0x350   : > { %v877_v54 = vpop.permute.xlu0 %876 }
 0x352   : > { %1164 = vmatpush3.bf16.msra.mxu0 %v873_v53 }
 0x353   : > { %1165 = vmatprep.subr.bf16.mxu0 %v877_v54 }
 0x356   : > { %1166 = vmatpush3.bf16.msra.mxu0 %v877_v54 }
 0x357   : > { %1167 = vmatprep.subr.bf16.mxu0 %v879_v55 }
 0x35a   : > { %1168 = vmatpush3.bf16.msra.mxu0 %v879_v55 }
 0x35d   : > { %1170 = vmatmul.mubr.msk.bf16.vlgmr.msra.gmra.mrb[0].mxu0 %vm791_vm5, %v1239_v56 }
 0x360   : > { %v387_v58 = vpop.permute.xlu1 %386 }
 0x361   : > { %v382_v57 = vpop.permute.xlu0 %381 }
 0x364   : > { %v397_v60 = vpop.permute.xlu1 %396 }
 0x365   : > { %v392_v59 = vpop.permute.xlu0 %391 }
 0x368   : > { %v894_v62 = vpop.permute.xlu1 %893 }
 0x369   : > { %v889_v61 = vpop.permute.xlu0 %888  ;;  %v1179_v7 = vadd.f32 %v894_v62, %v387_v58 }
 0x36a   : > { %v1175_v2 = vadd.f32 %v889_v61, %v382_v57 }
 0x36c   : > { %v904_v0 = vpop.permute.xlu1 %903 }
 0x36d   : > { %v899_v63 = vpop.permute.xlu0 %898  ;;  %v1177_v4 = vadd.f32 %v904_v0, %v397_v60 }
 0x36e   : > { %v1173_v1 = vadd.f32 %v899_v63, %v392_v59 }
 0x430   : > { %v1171_v3 = vpop.f32.mrb[0].mxu0 }
 0x431   : > { %v1174_v5 = vadd.f32 %v1173_v1, %v1171_v3  ;;  %v956_v6 = vpop.f32.mrb[1].mxu0 }
 0x432   : > { %v1176_v8 = vadd.f32 %v1175_v2, %v956_v6  ;;  %v1172_v9 = vpop.f32.mrb[2].mxu0 }
 0x433   : > { %978 = vst.msk [vmem:[%s356_s27 + $0x10] sm:$0xff] %vm975_vm6, %v1174_v5  ;;  %v1178_v10 = vadd.f32 %v1177_v4, %v1172_v9  ;;  %v959_v11 = vpop.f32.mrb[3].mxu0 }
 0x434   : > { %976 = vst.msk [vmem:[%s356_s27] sm:$0xff] %vm975_vm6, %v1176_v8  ;;  %v1180_v12 = vadd.f32 %v1179_v7, %v959_v11 }
 0x435   : > { %979 = vst.msk [vmem:[%s356_s27 + $0x18] sm:$0xff] %vm975_vm6, %v1178_v10 }
 0x436   : > { %977 = vst.msk [vmem:[%s356_s27 + $0x8] sm:$0xff] %vm975_vm6, %v1180_v12 }
 0x437 PF: > { %s19_s11 = sadd.s32 1, %s1262_s11   ;;  %s1479_s30 = smov %s1258_s10 }
 0x438   : > { %p16_p5 = scmp.ge.s32.totalorder %s19_s11, 4   ;;  %s1480_s10 = smov %s1482_s12 }
 0x43a   :  { %18 = sbr.rel (!%p16_p5) target bundleno = 2 (0x2), region = 86 }

</bundles_post_ra>
